<compile_context>
chip_gen: v5e
topology: v5e:2x2
jax: 0.10.0
libtpu: 0.0.40
codegen_flags: <defaults>
</compile_context>

<pallas_src>
import numpy as np
import jax
import jax.numpy as jnp
from jax.experimental import pallas as pl
from jax.experimental.pallas import tpu as pltpu


# ----------------------------------------------------------------------------- static matrices
def _adaptive_pool_matrix(in_size: int, bin_size: int) -> np.ndarray:
    """(bin_size, in_size): row p averages torch AdaptiveAvgPool2d's region p."""
    m = np.zeros((bin_size, in_size), np.float32)
    for p in range(bin_size):
        start = (p * in_size) // bin_size
        end = -((-(p + 1) * in_size) // bin_size)  # ceil((p+1)*in/bin)
        m[p, start:end] = 1.0 / (end - start)
    return m


def _bilinear_up_matrix(out_size: int, bin_size: int) -> np.ndarray:
    """(out_size, bin_size): bilinear interpolation, align_corners=True."""
    u = np.zeros((out_size, bin_size), np.float32)
    if bin_size == 1:
        u[:, 0] = 1.0
        return u
    if out_size == 1:          # align_corners=True with a single output row -> source index 0
        u[0, 0] = 1.0
        return u
    scale = (bin_size - 1) / (out_size - 1)
    for i in range(out_size):
        src = i * scale
        i0 = min(int(np.floor(src)), bin_size - 1)
        i1 = min(i0 + 1, bin_size - 1)
        frac = src - i0
        u[i, i0] += 1.0 - frac
        u[i, i1] += frac
    return u


# ----------------------------------------------------------------------------- kernel
def _make_ppm_kernel(Cin: int, hw_tile: int):
    """Grid = (N, HW//hw_tile). All bins of one batch element handled with batched matmuls."""

    def kernel(x_ref, mT_ref, w_ref, b_ref, msk_ref, uT_ref, o_ref, z_sc):
        # x_ref:   (1, Cin, HW)            one batch element, NCHW-flat, fetched once per n
        # mT_ref:  (HW, SSB)     f32       spatial adaptive-avg-pool, ALL bins packed
        # w_ref:   (NB*Cr, Cin)            stacked 1x1-conv weights with BN scale folded in
        # b_ref:   (NB*Cr, 1)    f32       folded BN bias
        # msk_ref: (NB*Cr, SSB)  f32       block-diagonal 0/1 mask (branch rows x own-bin cols)
        # uT_ref:  (SSB, hw_tile)          bilinear-upsample slab for this HW tile
        # o_ref:   (1, Cin + NB*Cr, hw_tile)
        # z_sc:    (NB*Cr, SSB)            scratch: per-batch-element branch activations
        t = pl.program_id(1)

        @pl.when(t == 0)
        def _():
            # Adaptive avg-pool of every bin in ONE matmul; kept in f32 for accuracy
            # (pool weights like 1/HW round poorly in bf16 at large HW).
            pooled = jnp.dot(x_ref[0], mT_ref[...],
                             preferred_element_type=jnp.float32)            # (Cin, SSB)
            # Batched 1x1 conv (all branches): (NB*Cr, Cin) @ (Cin, SSB), f32 accumulate.
            z = jnp.dot(w_ref[...], pooled.astype(w_ref.dtype),
                        preferred_element_type=jnp.float32)                 # (NB*Cr, SSB)
            # BN shift + ReLU, then zero cross-bin garbage BEFORE the upsample matmul.
            z = jnp.maximum(z + b_ref[...], 0.0) * msk_ref[...]
            z_sc[...] = z.astype(z_sc.dtype)

        # x passthrough for this HW tile: exact f32, lane-aligned slice of the resident block.
        start = pl.multiple_of(t * hw_tile, hw_tile)
        o_ref[0, :Cin, :] = x_ref[0, :, pl.ds(start, hw_tile)].astype(o_ref.dtype)

        # Bilinear upsample of ALL branches for this tile: (NB*Cr, SSB) @ (SSB, hw_tile).
        up = jnp.dot(z_sc[...], uT_ref[...], preferred_element_type=jnp.float32)
        o_ref[0, Cin:, :] = up.astype(o_ref.dtype)

    return kernel


# ----------------------------------------------------------------------------- wrapper
def _pick_hw_tile(HW: int, target: int = 512) -> int:
    """Largest 128-multiple divisor of HW that is <= target (falls back to full HW)."""
    cands = [d for d in range(128, HW + 1, 128) if HW % d == 0]
    if not cands:
        # TODO(synk): handle non-128-multiple HW with an explicit (masked) remainder tile.
        return HW
    le = [d for d in cands if d <= target]
    return max(le) if le else min(cands)


def ppm_forward(x_nchw, conv_w, bn_gamma, bn_beta, bn_mean, bn_var, bins,
                eps=1e-5, compute_dtype=jnp.float32, hw_tile=None):
    """PPM forward (eval-mode BN). Accepts/returns NCHW like the PyTorch module.

    compute_dtype: operand dtype for the conv/upsample matmuls (bf16 is fine on v5e/v6e/v7x;
    pooling, accumulation, bias, ReLU and the x passthrough are always f32).
    """
    N, Cin, H, W = x_nchw.shape
    NB = len(bins)
    Cr = int(np.asarray(conv_w[0]).reshape(-1, Cin).shape[0])
    HW = H * W
    sizes = [b * b for b in bins]
    offs = np.cumsum([0] + sizes)
    SSB = int(offs[-1])
    NBCr = NB * Cr
    Ctot = Cin + NBCr
    if hw_tile is None:
        hw_tile = _pick_hw_tile(HW)
    assert HW % hw_tile == 0, (HW, hw_tile)
    T = HW // hw_tile

    m_rows, u_rows, w_l, b_l = [], [], [], []
    for bi, s in enumerate(bins):
        ph = _adaptive_pool_matrix(H, s)                  # (s, H)
        pw = _adaptive_pool_matrix(W, s)                  # (s, W)
        uh = _bilinear_up_matrix(H, s)                    # (H, s)
        uw = _bilinear_up_matrix(W, s)                    # (W, s)
        # Spatial-only pooling / upsampling matrices (no channel identity kron).
        m_rows.append(np.kron(ph, pw))                    # (s*s, H*W)
        u_rows.append(np.kron(uh, uw).T)                  # (s*s, H*W)
        # Fold inference-mode BatchNorm into the 1x1 conv.
        scale = np.asarray(bn_gamma[bi], np.float32) / np.sqrt(
            np.asarray(bn_var[bi], np.float32) + eps)
        w_eff = np.asarray(conv_w[bi], np.float32).reshape(Cr, Cin) * scale[:, None]   # (Cr, Cin)
        b_eff = np.asarray(bn_beta[bi], np.float32) - np.asarray(bn_mean[bi], np.float32) * scale
        w_l.append(w_eff)
        b_l.append(b_eff[:, None])

    # Pool matrix stays f32 (accuracy); conv / upsample operands in compute_dtype.
    mT_all = jnp.asarray(np.concatenate(m_rows, axis=0).T, dtype=jnp.float32)     # (HW, SSB)
    uT_all = jnp.asarray(np.concatenate(u_rows, axis=0), dtype=compute_dtype)     # (SSB, HW)
    w_stack = jnp.asarray(np.concatenate(w_l, axis=0), dtype=compute_dtype)       # (NB*Cr, Cin)
    b_stack = jnp.asarray(np.concatenate(b_l, axis=0), dtype=jnp.float32)         # (NB*Cr, 1)

    # Block-diagonal 0/1 mask: branch i's rows keep only bin i's packed columns.
    mask_np = np.zeros((NBCr, SSB), np.float32)
    for i in range(NB):
        mask_np[i * Cr:(i + 1) * Cr, offs[i]:offs[i + 1]] = 1.0
    mask = jnp.asarray(mask_np)

    x3 = x_nchw.reshape(N, Cin, HW).astype(jnp.float32)   # metadata-only reshape, stays NCHW

    # NOTE: at realistic PPM sizes (Cin~2048, HW~3600) pass a computed
    # pltpu.CompilerParams(vmem_limit_bytes=...) — the toy test sizes stay under the default.
    out = pl.pallas_call(
        _make_ppm_kernel(Cin, hw_tile),
        out_shape=jax.ShapeDtypeStruct((N, Ctot, HW), jnp.float32),
        grid=(N, T),
        in_specs=[
            # x: block index constant across t -> DMA'd once per batch element, reused by tiles.
            pl.BlockSpec((1, Cin, HW), lambda n, t: (n, 0, 0)),
            pl.BlockSpec((HW, SSB), lambda n, t: (0, 0)),
            pl.BlockSpec((NBCr, Cin), lambda n, t: (0, 0)),
            pl.BlockSpec((NBCr, 1), lambda n, t: (0, 0)),
            pl.BlockSpec((NBCr, SSB), lambda n, t: (0, 0)),
            pl.BlockSpec((SSB, hw_tile), lambda n, t: (0, t)),
        ],
        out_specs=pl.BlockSpec((1, Ctot, hw_tile), lambda n, t: (n, 0, t)),  # lane axis dense
        scratch_shapes=[pltpu.VMEM((NBCr, SSB), compute_dtype)],
        compiler_params=pltpu.CompilerParams(
            dimension_semantics=("parallel", "arbitrary")),
    )(x3, mT_all, w_stack, b_stack, mask, uT_all)

    return out.reshape(N, Ctot, H, W)   # metadata-only reshape; no transposes, no concat


# ----------------------------------------------------------------------------- numpy reference
def ppm_reference(x_nchw, conv_w, bn_gamma, bn_beta, bn_mean, bn_var, bins, eps=1e-5):
    """Pure-numpy reference (same math as torch PPM in eval mode)."""
    x_np = np.asarray(x_nchw, dtype=np.float32)
    N, Cin, H, W = x_np.shape
    outs = [x_np]
    for bi, s in enumerate(bins):
        ph = _adaptive_pool_matrix(H, s)
        pw = _adaptive_pool_matrix(W, s)
        uh = _bilinear_up_matrix(H, s)
        uw = _bilinear_up_matrix(W, s)
        pooled = np.einsum('ph,qw,nchw->ncpq', ph, pw, x_np)
        scale = np.asarray(bn_gamma[bi]) / np.sqrt(np.asarray(bn_var[bi]) + eps)
        w = np.asarray(conv_w[bi]).reshape(-1, Cin)
        b_eff = np.asarray(bn_beta[bi]) - np.asarray(bn_mean[bi]) * scale
        z = np.einsum('rc,ncpq->nrpq', w, pooled) * scale[None, :, None, None] \
            + b_eff[None, :, None, None]
        z = np.maximum(z, 0.0)
        up = np.einsum('hp,wq,nrpq->nrhw', uh, uw, z)
        outs.append(up.astype(np.float32))
    return np.concatenate(outs, axis=1)


if __name__ == "__main__":
    # PPM(in_dim=8, reduction_dim=4, bins=(1, 2, 3, 6)) on a small input.
    key = jax.random.PRNGKey(0)
    N, Cin, H, W = 2, 8, 16, 16
    Cr = 4
    bins = (1, 2, 3, 6)

    keys = jax.random.split(key, 1 + 5 * len(bins))
    x = jax.random.normal(keys[0], (N, Cin, H, W), jnp.float32)

    # Deterministic synthetic parameters (conv weight + BN eval-mode stats/affine per branch).
    conv_w, bn_gamma, bn_beta, bn_mean, bn_var = [], [], [], [], []
    for i in range(len(bins)):
        k = keys[1 + 5 * i: 1 + 5 * (i + 1)]
        conv_w.append(np.asarray(jax.random.normal(k[0], (Cr, Cin), jnp.float32)) * 0.1)
        bn_gamma.append(np.asarray(jax.random.uniform(k[1], (Cr,), jnp.float32, 0.5, 1.5)))
        bn_beta.append(np.asarray(jax.random.normal(k[2], (Cr,), jnp.float32)) * 0.1)
        bn_mean.append(np.asarray(jax.random.normal(k[3], (Cr,), jnp.float32)) * 0.1)
        bn_var.append(np.asarray(jax.random.uniform(k[4], (Cr,), jnp.float32, 0.5, 1.5)))

    ref = ppm_reference(x, conv_w, bn_gamma, bn_beta, bn_mean, bn_var, bins)

    # f32 operands, explicit multi-tile HW path (2 tiles of 128 lanes).
    out = ppm_forward(x, conv_w, bn_gamma, bn_beta, bn_mean, bn_var, bins,
                      compute_dtype=jnp.float32, hw_tile=128)
    out = jax.block_until_ready(out)
    assert out.shape == (N, Cin + len(bins) * Cr, H, W), out.shape
    np.testing.assert_allclose(np.asarray(out), ref, rtol=5e-3, atol=5e-3)

    # bf16 conv/upsample operands (MXU fast path on v5e/v6e/v7x), auto HW tile; f32 accumulate.
    out_bf16 = ppm_forward(x, conv_w, bn_gamma, bn_beta, bn_mean, bn_var, bins,
                           compute_dtype=jnp.bfloat16)
    out_bf16 = jax.block_until_ready(out_bf16)
    assert out_bf16.shape == (N, Cin + len(bins) * Cr, H, W), out_bf16.shape
    np.testing.assert_allclose(np.asarray(out_bf16), ref, rtol=3e-2, atol=3e-2)

    print("KERNEL_OK")
</pallas_src>

<mosaic_0001>
module attributes {stable_mosaic.version = 11 : i64} {
  func.func @kernel(%arg0: i32, %arg1: i32, %arg2: memref<1x8x256xf32, #tpu.memory_space<vmem>>, %arg3: memref<256x50xf32, #tpu.memory_space<vmem>>, %arg4: memref<16x8xf32, #tpu.memory_space<vmem>>, %arg5: memref<16x1xf32, #tpu.memory_space<vmem>>, %arg6: memref<16x50xf32, #tpu.memory_space<vmem>>, %arg7: memref<50x128xf32, #tpu.memory_space<vmem>>, %arg8: memref<1x24x128xf32, #tpu.memory_space<vmem>>, %arg9: memref<16x50xf32, #tpu.memory_space<vmem>>) attributes {dimension_semantics = [#tpu.dimension_semantics<parallel>, #tpu.dimension_semantics<arbitrary>], iteration_bounds = array<i64: 2, 2>, scalar_prefetch = 0 : i64, scratch_operands = 1 : i64, tpu.core_type = #tpu.core_type<tc>, window_params = [{transform_indices = @transform_0, window_bounds = array<i64: 1, 8, 256>}, {pipeline_mode = #tpu.pipeline_mode<synchronous>, transform_indices = @transform_1, window_bounds = array<i64: 256, 50>}, {pipeline_mode = #tpu.pipeline_mode<synchronous>, transform_indices = @transform_2, window_bounds = array<i64: 16, 8>}, {pipeline_mode = #tpu.pipeline_mode<synchronous>, transform_indices = @transform_3, window_bounds = array<i64: 16, 1>}, {pipeline_mode = #tpu.pipeline_mode<synchronous>, transform_indices = @transform_4, window_bounds = array<i64: 16, 50>}, {transform_indices = @transform_5, window_bounds = array<i64: 50, 128>}, {transform_indices = @transform_6, window_bounds = array<i64: 1, 24, 128>}]} {
    %c0_i32 = arith.constant 0 : i32
    %0 = arith.cmpi eq, %arg1, %c0_i32 : i32
    %1 = arith.extui %0 : i1 to i32
    %c0_i32_0 = arith.constant 0 : i32
    %2 = arith.cmpi ne, %1, %c0_i32_0 : i32
    scf.if %2 {
      %c0_11 = arith.constant 0 : index
      %c0_12 = arith.constant 0 : index
      %c0_13 = arith.constant 0 : index
      %17 = vector.load %arg2[%c0_11, %c0_12, %c0_13] : memref<1x8x256xf32, #tpu.memory_space<vmem>>, vector<1x8x256xf32>
      %18 = vector.shape_cast %17 : vector<1x8x256xf32> to vector<8x256xf32>
      %c0_14 = arith.constant 0 : index
      %c0_15 = arith.constant 0 : index
      %19 = vector.load %arg3[%c0_14, %c0_15] : memref<256x50xf32, #tpu.memory_space<vmem>>, vector<256x50xf32>
      %cst_16 = arith.constant dense<0.000000e+00> : vector<8x50xf32>
      %20 = tpu.matmul %18, %19, %cst_16 {dimension_numbers = #tpu.dot_dimension_numbers<[1], [0], [0], [1], [0, 0, 1, 1], [], []>} : vector<8x256xf32>, vector<256x50xf32>, vector<8x50xf32> -> vector<8x50xf32>
      %c0_17 = arith.constant 0 : index
      %c0_18 = arith.constant 0 : index
      %21 = vector.load %arg4[%c0_17, %c0_18] : memref<16x8xf32, #tpu.memory_space<vmem>>, vector<16x8xf32>
      %cst_19 = arith.constant dense<0.000000e+00> : vector<16x50xf32>
      %22 = tpu.matmul %21, %20, %cst_19 {dimension_numbers = #tpu.dot_dimension_numbers<[1], [0], [0], [1], [0, 0, 1, 1], [], []>} : vector<16x8xf32>, vector<8x50xf32>, vector<16x50xf32> -> vector<16x50xf32>
      %c0_20 = arith.constant 0 : index
      %c0_21 = arith.constant 0 : index
      %23 = vector.load %arg5[%c0_20, %c0_21] : memref<16x1xf32, #tpu.memory_space<vmem>>, vector<16x1xf32>
      %24 = vector.broadcast %23 : vector<16x1xf32> to vector<16x50xf32>
      %25 = arith.addf %22, %24 : vector<16x50xf32>
      %cst_22 = arith.constant 0.000000e+00 : f32
      %26 = vector.broadcast %cst_22 : f32 to vector<16x50xf32>
      %27 = arith.maximumf %25, %26 : vector<16x50xf32>
      %c0_23 = arith.constant 0 : index
      %c0_24 = arith.constant 0 : index
      %28 = vector.load %arg6[%c0_23, %c0_24] : memref<16x50xf32, #tpu.memory_space<vmem>>, vector<16x50xf32>
      %29 = arith.mulf %27, %28 : vector<16x50xf32>
      %c0_25 = arith.constant 0 : index
      %c0_26 = arith.constant 0 : index
      %30 = vector.load %arg9[%c0_25, %c0_26] : memref<16x50xf32, #tpu.memory_space<vmem>>, vector<16x50xf32>
      tpu.vector_store %arg9[%c0_25, %c0_26], %29 {strides = array<i32>} : memref<16x50xf32, #tpu.memory_space<vmem>>, vector<16x50xf32>,
    } else {
    }
    %c128_i32 = arith.constant 128 : i32
    %3 = arith.muli %arg1, %c128_i32 : i32
    %4 = tpu.assume_multiple %3, 128 : i32
    %c0 = arith.constant 0 : index
    %c0_1 = arith.constant 0 : index
    %5 = arith.index_cast %4 : i32 to index
    %6 = vector.load %arg2[%c0, %c0_1, %5] : memref<1x8x256xf32, #tpu.memory_space<vmem>>, vector<1x8x128xf32>
    %7 = vector.shape_cast %6 : vector<1x8x128xf32> to vector<8x128xf32>
    %c0_2 = arith.constant 0 : index
    %c0_3 = arith.constant 0 : index
    %c0_4 = arith.constant 0 : index
    %8 = vector.load %arg8[%c0_2, %c0_3, %c0_4] : memref<1x24x128xf32, #tpu.memory_space<vmem>>, vector<1x8x128xf32>
    %9 = vector.shape_cast %8 : vector<1x8x128xf32> to vector<8x128xf32>
    %10 = vector.shape_cast %7 : vector<8x128xf32> to vector<1x8x128xf32>
    tpu.vector_store %arg8[%c0_2, %c0_3, %c0_4], %10 {strides = array<i32>} : memref<1x24x128xf32, #tpu.memory_space<vmem>>, vector<1x8x128xf32>,
    %c0_5 = arith.constant 0 : index
    %c0_6 = arith.constant 0 : index
    %11 = vector.load %arg9[%c0_5, %c0_6] : memref<16x50xf32, #tpu.memory_space<vmem>>, vector<16x50xf32>
    %c0_7 = arith.constant 0 : index
    %c0_8 = arith.constant 0 : index
    %12 = vector.load %arg7[%c0_7, %c0_8] : memref<50x128xf32, #tpu.memory_space<vmem>>, vector<50x128xf32>
    %cst = arith.constant dense<0.000000e+00> : vector<16x128xf32>
    %13 = tpu.matmul %11, %12, %cst {dimension_numbers = #tpu.dot_dimension_numbers<[1], [0], [0], [1], [0, 0, 1, 1], [], []>} : vector<16x50xf32>, vector<50x128xf32>, vector<16x128xf32> -> vector<16x128xf32>
    %c0_9 = arith.constant 0 : index
    %c8 = arith.constant 8 : index
    %c0_10 = arith.constant 0 : index
    %14 = vector.load %arg8[%c0_9, %c8, %c0_10] : memref<1x24x128xf32, #tpu.memory_space<vmem>>, vector<1x16x128xf32>
    %15 = vector.shape_cast %14 : vector<1x16x128xf32> to vector<16x128xf32>
    %16 = vector.shape_cast %13 : vector<16x128xf32> to vector<1x16x128xf32>
    tpu.vector_store %arg8[%c0_9, %c8, %c0_10], %16 {strides = array<i32>} : memref<1x24x128xf32, #tpu.memory_space<vmem>>, vector<1x16x128xf32>,
    return
  }
  func.func @transform_0(%arg0: i32, %arg1: i32) -> (i32, i32, i32) {
    %c0_i32 = arith.constant 0 : i32
    %c0_i32_0 = arith.constant 0 : i32
    %c0_i32_1 = arith.constant 0 : i32
    return %arg0, %c0_i32, %c0_i32_0 : i32, i32, i32
  }
  func.func @transform_1(%arg0: i32, %arg1: i32) -> (i32, i32) {
    %c0_i32 = arith.constant 0 : i32
    %c0_i32_0 = arith.constant 0 : i32
    %c0_i32_1 = arith.constant 0 : i32
    return %c0_i32, %c0_i32_0 : i32, i32
  }
  func.func @transform_2(%arg0: i32, %arg1: i32) -> (i32, i32) {
    %c0_i32 = arith.constant 0 : i32
    %c0_i32_0 = arith.constant 0 : i32
    %c0_i32_1 = arith.constant 0 : i32
    return %c0_i32, %c0_i32_0 : i32, i32
  }
  func.func @transform_3(%arg0: i32, %arg1: i32) -> (i32, i32) {
    %c0_i32 = arith.constant 0 : i32
    %c0_i32_0 = arith.constant 0 : i32
    %c0_i32_1 = arith.constant 0 : i32
    return %c0_i32, %c0_i32_0 : i32, i32
  }
  func.func @transform_4(%arg0: i32, %arg1: i32) -> (i32, i32) {
    %c0_i32 = arith.constant 0 : i32
    %c0_i32_0 = arith.constant 0 : i32
    %c0_i32_1 = arith.constant 0 : i32
    return %c0_i32, %c0_i32_0 : i32, i32
  }
  func.func @transform_5(%arg0: i32, %arg1: i32) -> (i32, i32) {
    %c0_i32 = arith.constant 0 : i32
    %c0_i32_0 = arith.constant 0 : i32
    return %c0_i32, %arg1 : i32, i32
  }
  func.func @transform_6(%arg0: i32, %arg1: i32) -> (i32, i32, i32) {
    %c0_i32 = arith.constant 0 : i32
    %c0_i32_0 = arith.constant 0 : i32
    return %arg0, %c0_i32, %arg1 : i32, i32, i32
  }
}

</mosaic_0001>

<bundles_post_ra>
// kernel: tpu_custom_call.1
= control target key start
LH: loop header
LB: loop body
LE: loop exit
PB: predicated region body
PF: predicated region fallthrough
CT: control target
= control target key end

     0   :  { %s1208_s0 = inlined_call_operand.vmem [shape: f32[2,8,256], index: 0, kind: input, shape index: {}]   ;;  %s1209_s1 = inlined_call_operand.vmem [shape: f32[256,50], index: 1, kind: input, shape index: {}]   ;;  %s1210_s2 = inlined_call_operand.vmem [shape: f32[16,8], index: 2, kind: input, shape index: {}]   ;;  %s1211_s3 = inlined_call_operand.vmem [shape: f32[16,1], index: 3, kind: input, shape index: {}]   ;;  %s1212_s4 = inlined_call_operand.vmem [shape: f32[16,50], index: 4, kind: input, shape index: {}]   ;;  %s1213_s5 = inlined_call_operand.vmem [shape: f32[50,256], index: 5, kind: input, shape index: {}]   ;;  %s1214_s6 = inlined_call_operand.hbm [shape: f32[2,24,256], index: 6, kind: output, shape index: {}]  }
   0x1   :  { %1220 = sst [smem:[#allocation11_spill]] %s1213_s5 }
   0x2   :  { %11 = vsyncpa [#allocation5], 0 }
   0x3   :  { %13 = vsyncpa [#allocation5 + $0x1], 0  ;;  %s912_s21 = smov 0   ;;  %s914_s22 = smov 0  }
   0x4   :  { %s916_s23 = smov 0   ;;  %s918_s24 = smov 0  }
   0x5   :  { %s920_s25 = smov 0   ;;  %s922_s26 = smov 0  }
   0x6   :  { %s924_s27 = smov 0   ;;  %s926_s28 = smov 0  }
   0x7   :  { %s928_s29 = smov 0   ;;  %s930_s30 = smov 0  }
   0x8 LB: > { %1221 = sst [smem:[#allocation7_spill]] %s863_s28  ;;  %s638_s7 = sadd.s32 4294967295, %s871_s30   ;;  %s871_s30 = sphi %s930_s30, %s19_s30   ;;  %s867_s29 = sphi %s928_s29, %s1233_s29   ;;  %s863_s28 = sphi %s926_s28, %s1232_s28   ;;  %s859_s27 = sphi %s924_s27, %s1231_s27   ;;  %s855_s26 = sphi %s922_s26, %s1230_s26   ;;  %s851_s25 = sphi %s920_s25, %s1238_s25   ;;  %s847_s24 = sphi %s918_s24, %s1237_s24   ;;  %s843_s23 = sphi %s916_s23, %s1236_s23   ;;  %s839_s22 = sphi %s914_s22, %s1235_s22   ;;  %s835_s21 = sphi %s912_s21, %s1234_s21  }
   0x9   : > { %1222 = sst [smem:[#allocation8_spill]] %s867_s29  ;;  %s639_s8 = sadd.s32 4294967294, %s871_s30  }
   0xa   : > { %s28_s9 = sadd.s32 1, %s863_s28  ;;  %s31_s10 = sadd.s32 1, %s867_s29 }
   0xb   : > { %p29_p0 = scmp.ge.s32.totalorder %s28_s9, 2  ;;  %s148_s11 = sadd.s32 1, %s851_s25 }
   0xc   : > { %p155_p1 = scmp.ne.s32.totalorder %s851_s25, %s847_s24  ;;  %p156_p2 = scmp.eq.s32.totalorder %s871_s30, 0 }
   0xd   : > { %s1240_s9 = smov (%p29_p0, %s28_s9), 0  ;;  %s1242_s10 = smov (!%p29_p0, %s31_s10), %s867_s29 }
   0xe   : > { %1223 = sst [smem:[#allocation9_spill]] %s1240_s9  ;;  %s145_s12 = ssub.s32 %s863_s28, %s1240_s9 }
   0xf   : > { %p975_p3 = por %p156_p2, %p155_p1  ;;  %p33_p4 = scmp.ge.s32.totalorder %s1242_s10, 2 }
  0x10   : > { %p146_p5 = scmp.eq.s32.totalorder %s145_s12, 0  ;;  %s176_s14 = sadd.s32 1, %s843_s23 }
  0x11   : > { %p186_p6 = scmp.ne.s32.totalorder %s843_s23, %s839_s22  ;;  %s1244_s10 = smov (%p33_p4, %s1242_s10), 0 }
  0x12   : > { %1225 = sst [smem:[#allocation10_spill]] %s1244_s10  ;;  %s171_s16 = ssub.s32 %s867_s29, %s1244_s10 }
  0x13   : > { %s985_s15 = scalar_select %p146_p5, %s851_s25, %s148_s11  }
  0x14   : > { %p187_p7 = scmp.eq.s32.totalorder %s638_s7, 3  ;;  %s173_s17 = sor.u32 %s171_s16, %s145_s12 }
  0x15   : > { %p192_p8 = scmp.ne.s32.totalorder %s839_s22, %s835_s21  ;;  %p174_p9 = scmp.eq.s32.totalorder %s173_s17, 0 }
  0x16   : > { %p991_p10 = por %p187_p7, %p186_p6  ;;  %p193_p11 = scmp.eq.s32.totalorder %s639_s8, 3 }
  0x17   : > { %s996_s19 = scalar_select %p174_p9, %s843_s23, %s176_s14  }
  0x18   : > { %p998_p12 = por %p193_p11, %p192_p8  ;;  %p641_p13 = scmp.ge.s32.totalorder %s871_s30, 4 }
  0x1a   : > { %221 = sbr.rel (%p641_p13) target bundleno = 48 (0x30), region = 32 }
  0x1f   : > { %232 = sbr.rel (!%p975_p3) target bundleno = 48 (0x30), region = 40  ;;  %s234_s7 = sand.u32 (%p975_p3), 1, %s851_s25  }
  0x20   : > { %s642_s11 = sshll.u32 (%p975_p3), %s863_s28, 3  ;;  %s665_s12 = smul.u32 (%p975_p3), 56, %s234_s7 }
  0x21   : > { %s1228_s5 = sld [smem:[#allocation11_spill]] (%p975_p3) }
  0x22   : > { %s236_s14 = scalar_lea.vmem (%p975_p3), [#allocation3], %s665_s12 }
  0x27   : > { %s238_s8 = scalar_lea.vmem %s1228_s5, %s642_s11 }
  0x28   : > { %v279_v0 = vld [vmem:[%s238_s8] sm:$0xff]  ;;  %v281_v1 = vld [vmem:[%s238_s8 + $0x10] sm:$0xff] }
  0x29   : > { %v283_v2 = vld [vmem:[%s238_s8 + $0x20] sm:$0xff]  ;;  %280 = vst [vmem:[%s236_s14] sm:$0xff] %v279_v0  ;;  %v285_v3 = vld [vmem:[%s238_s8 + $0x30] sm:$0xff] }
  0x2a   : > { %282 = vst [vmem:[%s236_s14 + $0x8] sm:$0xff] %v281_v1  ;;  %v287_v4 = vld [vmem:[%s238_s8 + $0x40] sm:$0xff]  ;;  %v289_v5 = vld [vmem:[%s238_s8 + $0x50] sm:$0xff] }
  0x2b   : > { %284 = vst [vmem:[%s236_s14 + $0x10] sm:$0xff] %v283_v2  ;;  %v291_v6 = vld [vmem:[%s238_s8 + $0x60] sm:$0xff] }
  0x2c   : > { %286 = vst [vmem:[%s236_s14 + $0x18] sm:$0xff] %v285_v3 }
  0x2d   : > { %288 = vst [vmem:[%s236_s14 + $0x20] sm:$0xff] %v287_v4 }
  0x2e   : > { %290 = vst [vmem:[%s236_s14 + $0x28] sm:$0xff] %v289_v5 }
  0x2f   : > { %292 = vst [vmem:[%s236_s14 + $0x30] sm:$0xff] %v291_v6 }
  0x30 PF: > { %p643_p0 = scmp.ge.s32.totalorder %s871_s30, 1  ;;  %p297_p1 = scmp.lt.s32.totalorder %s871_s30, 5 }
  0x32   : > { %p298_p2 = pnand %p643_p0, %p297_p1 }
  0x33   : > { %s304_s13 = sand.u32 (!%p298_p2), 1, %s847_s24   ;;  %s1218_s7 = sand.u32 (!%p298_p2), 1, %s839_s22  }
  0x34   : > { %301 = sbr.rel (%p298_p2) target bundleno = 518 (0x206), region = 78  ;;  %p338_p3 = scmp.lt.s32.totalorder (!%p298_p2), %s859_s27, 1 }
  0x35   : > { %s666_s11 = smul.u32 (!%p298_p2), 56, %s304_s13  ;;  %p646_p4 = scmp.ne.s32.totalorder (!%p298_p2), %s855_s26, 0 }
  0x36   : > { %s667_s12 = smul.u32 (!%p298_p2), 24, %s1218_s7 }
  0x37   : > { %s1023_s10 = scalar_lea.vmem (!%p298_p2), [#allocation3], %s666_s11 }
  0x38   : > { %s1025_s9 = scalar_lea.vmem (!%p298_p2), [#allocation4], %s667_s12 }
  0x39   : > { %s339_s16 = scalar_select %p338_p3, %s859_s27, 1 }
  0x3a   : > { %346 = sbr.rel (%p646_p4) target bundleno = 372 (0x174), region = 86 }
  0x3b   : > { %s657_s17 = sshll.u32 %s339_s16, 4 }
  0x3c   : > { %s1021_s5 = scalar_lea.vmem %s1208_s0, %s657_s17 }
  0x3f   : > { %v364_v7 = vld [vmem:[%s1209_s1 + $0x78] sm:$0xff]  ;;  %v363_v9 = vld [vmem:[%s1209_s1 + $0x70] sm:$0xff]  ;;  %v362_v11 = vld [vmem:[%s1209_s1 + $0x68] sm:$0xff]  ;;  %v873_v41 = vmov 0   ;;  %vm435_vm0 = vcmask 64512   ;;  %vm471_vm1 = vcmask 408576  }
  0x40   : > { %v380_v8 = vld [vmem:[%s1209_s1 + $0xf8] sm:$0xff]  ;;  %381 = vmatpush.msra.mxu0 %v364_v7  ;;  %v379_v10 = vld [vmem:[%s1209_s1 + $0xf0] sm:$0xff]  ;;  %v378_v12 = vld [vmem:[%s1209_s1 + $0xe8] sm:$0xff]  ;;  %760 = vset.pattern.permute.xlu0 %v873_v41 }
  0x41   : > { %401 = vmatpush.msra.mxu1 %v380_v8  ;;  %v361_v13 = vld [vmem:[%s1209_s1 + $0x60] sm:$0xff]  ;;  %v360_v15 = vld [vmem:[%s1209_s1 + $0x58] sm:$0xff]  ;;  %v359_v17 = vld [vmem:[%s1209_s1 + $0x50] sm:$0xff] }
  0x42   : > { %382 = vmatpush.msra.mxu0 %v363_v9  ;;  %v377_v14 = vld [vmem:[%s1209_s1 + $0xe0] sm:$0xff]  ;;  %v376_v16 = vld [vmem:[%s1209_s1 + $0xd8] sm:$0xff]  ;;  %v375_v18 = vld [vmem:[%s1209_s1 + $0xd0] sm:$0xff] }
  0x43   : > { %402 = vmatpush.msra.mxu1 %v379_v10  ;;  %v358_v19 = vld [vmem:[%s1209_s1 + $0x48] sm:$0xff]  ;;  %v357_v21 = vld [vmem:[%s1209_s1 + $0x40] sm:$0xff]  ;;  %v356_v23 = vld [vmem:[%s1209_s1 + $0x38] sm:$0xff] }
  0x44   : > { %383 = vmatpush.msra.mxu0 %v362_v11  ;;  %v374_v20 = vld [vmem:[%s1209_s1 + $0xc8] sm:$0xff]  ;;  %v373_v22 = vld [vmem:[%s1209_s1 + $0xc0] sm:$0xff]  ;;  %v372_v24 = vld [vmem:[%s1209_s1 + $0xb8] sm:$0xff] }
  0x45   : > { %403 = vmatpush.msra.mxu1 %v378_v12  ;;  %v355_v25 = vld [vmem:[%s1209_s1 + $0x30] sm:$0xff]  ;;  %v354_v27 = vld [vmem:[%s1209_s1 + $0x28] sm:$0xff]  ;;  %v353_v29 = vld [vmem:[%s1209_s1 + $0x20] sm:$0xff] }
  0x46   : > { %384 = vmatpush.msra.mxu0 %v361_v13  ;;  %v371_v26 = vld [vmem:[%s1209_s1 + $0xb0] sm:$0xff]  ;;  %v370_v28 = vld [vmem:[%s1209_s1 + $0xa8] sm:$0xff]  ;;  %v369_v30 = vld [vmem:[%s1209_s1 + $0xa0] sm:$0xff] }
  0x47   : > { %404 = vmatpush.msra.mxu1 %v377_v14  ;;  %v352_v31 = vld [vmem:[%s1209_s1 + $0x18] sm:$0xff]  ;;  %v351_v33 = vld [vmem:[%s1209_s1 + $0x10] sm:$0xff]  ;;  %v350_v35 = vld [vmem:[%s1209_s1 + $0x8] sm:$0xff] }
  0x48   : > { %385 = vmatpush.msra.mxu0 %v360_v15  ;;  %v368_v32 = vld [vmem:[%s1209_s1 + $0x98] sm:$0xff]  ;;  %v367_v34 = vld [vmem:[%s1209_s1 + $0x90] sm:$0xff]  ;;  %v366_v36 = vld [vmem:[%s1209_s1 + $0x88] sm:$0xff] }
  0x49   : > { %405 = vmatpush.msra.mxu1 %v376_v16  ;;  %v349_v37 = vld [vmem:[%s1209_s1] sm:$0xff]  ;;  %v348_v40 = vld [vmem:[%s1021_s5 + $0x8] sm:$0xff] }
  0x4a   : > { %386 = vmatpush.msra.mxu0 %v359_v17  ;;  %v365_v38 = vld [vmem:[%s1209_s1 + $0x80] sm:$0xff]  ;;  %v424_v43 = vld [vmem:[%s1211_s3 + $0x8] sm:$0xff] }
  0x4b   : > { %406 = vmatpush.msra.mxu1 %v375_v18  ;;  %v347_v39 = vld [vmem:[%s1021_s5] sm:$0xff]  ;;  %v422_v48 = vld [vmem:[%s1210_s2 + $0x8] sm:$0xff] }
  0x4c   : > { %387 = vmatpush.msra.mxu0 %v358_v19  ;;  %v423_v42 = vld [vmem:[%s1211_s3] sm:$0xff]  ;;  %v468_v58 = vld [vmem:[%s1212_s4 + $0x8] sm:$0xff] }
  0x4d   : > { %407 = vmatpush.msra.mxu1 %v374_v20  ;;  %427 = vperm.xlu0 %760, %v423_v42   ;;  %v421_v47 = vld [vmem:[%s1210_s2] sm:$0xff] }
  0x4e   : > { %388 = vmatpush.msra.mxu0 %v357_v21  ;;  %v467_v52 = vld [vmem:[%s1212_s4] sm:$0xff] }
  0x4f   : > { %408 = vmatpush.msra.mxu1 %v373_v22 }
  0x50   : > { %389 = vmatpush.msra.mxu0 %v356_v23 }
  0x51   : > { %409 = vmatpush.msra.mxu1 %v372_v24 }
  0x52   : > { %390 = vmatpush.msra.mxu0 %v355_v25 }
  0x53   : > { %410 = vmatpush.msra.mxu1 %v371_v26 }
  0x54   : > { %391 = vmatpush.msra.mxu0 %v354_v27 }
  0x55   : > { %411 = vmatpush.msra.mxu1 %v370_v28  ;;  %432 = vperm.xlu0 %760, %v424_v43  }
  0x56   : > { %392 = vmatpush.msra.mxu0 %v353_v29 }
  0x57   : > { %412 = vmatpush.msra.mxu1 %v369_v30 }
  0x58   : > { %393 = vmatpush.msra.mxu0 %v352_v31 }
  0x59   : > { %413 = vmatpush.msra.mxu1 %v368_v32 }
  0x5a   : > { %394 = vmatpush.msra.mxu0 %v351_v33 }
  0x5b   : > { %414 = vmatpush.msra.mxu1 %v367_v34 }
  0x5c   : > { %395 = vmatpush.msra.mxu0 %v350_v35 }
  0x5d   : > { %415 = vmatpush.msra.mxu1 %v366_v36 }
  0x5e   : > { %396 = vmatpush.msra.mxu0 %v349_v37 }
  0x5f   : > { %416 = vmatpush.msra.mxu1 %v365_v38  ;;  %397 = vmatmul.f32.vlgmr.msra.gmra.mxu0 %v347_v39 }
  0x60   : > { %417 = vmatmul.f32.vlgmr.msra.gmra.mxu1 %v348_v40 }
  0xbf   : > { %v428_v49 = vpop.permute.xlu0 %427 }
  0xc7   : > { %v433_v55 = vpop.permute.xlu0 %432 }
  0xdc   : > { %v398_v44 = vpop.f32.mrf.mxu0 }
  0xdd   : > { %v418_v45 = vpop.f32.mrf.mxu1 }
  0xde   : > { %v419_v46 = vadd.f32 %v418_v45, %v398_v44 }
  0xe0   : > { %457 = vmatpush.msra.mxu2 %v419_v46 }
  0xe1   : > { %647 = vmatmul.msk.f32.vlgmr.msra.gmra.mxu2 %vm435_vm0, %v421_v47 }
  0xe9   : > { %648 = vmatmul.msk.f32.gmra.mxu2 %vm435_vm0, %v422_v48 }
 0x164   : > { %v459_v50 = vpop.f32.mrf.mxu2 }
 0x165   : > { %v460_v51 = vadd.f32 %v459_v50, %v428_v49 }
 0x167   : > { %v465_v53 = vmax.f32 %v460_v51, 0.0 }
 0x169   : > { %v469_v54 = vmul.f32 %v467_v52, %v465_v53 }
 0x16b   : > { %472 = vst.msk [vmem:[#allocation2] sm:$0xff] %vm471_vm1, %v469_v54 }
 0x16c   : > { %v462_v56 = vpop.f32.mrf.mxu2 }
 0x16d   : > { %v463_v57 = vadd.f32 %v462_v56, %v433_v55 }
 0x16f   : > { %v466_v59 = vmax.f32 %v463_v57, 0.0 }
 0x171   : > { %v470_v60 = vmul.f32 %v468_v58, %v466_v59 }
 0x173   : > { %473 = vst.msk [vmem:[#allocation2 + $0x8] sm:$0xff] %vm471_vm1, %v470_v60 }
 0x174 PF: > { %v489_v61 = vld [vmem:[%s1023_s10 + $0x30] sm:$0x3]  ;;  %vm497_vm2 = vcmask 1041408   ;;  %v488_v62 = vld [vmem:[%s1023_s10 + $0x28] sm:$0xff]  ;;  %v487_v63 = vld [vmem:[%s1023_s10 + $0x20] sm:$0xff]  ;;  %vm490_vm3 = vcmask 408576  }
 0x175   : > { %651 = vmatpush.msk.msra.mxu0 %vm497_vm2, %v489_v61  ;;  %658 = vmatpush.msk.msra.mxu1 %vm497_vm2, %v489_v61  ;;  %v486_v0 = vld [vmem:[%s1023_s10 + $0x18] sm:$0xff]  ;;  %v485_v1 = vld [vmem:[%s1023_s10 + $0x10] sm:$0xff]  ;;  %v484_v2 = vld [vmem:[%s1023_s10 + $0x8] sm:$0xff]  ;;  %s649_s29 = sshll.u32 %s855_s26, 7  ;;  %s540_s17 = sshll.u32 %s1025_s9, 4  ;;  %s541_s17 = int_to_ptr.vmem [resolvable:$true] %s540_s17 }
 0x176   : > { %v483_v3 = vld [vmem:[%s1023_s10] sm:$0xff]  ;;  %v481_v4 = vld [vmem:[#allocation2] sm:$0xff]  ;;  %s475_s14 = sshra.s32 %s649_s29, 7  ;;  %s668_s10 = smul.u32 6, %s859_s27 }
 0x177   : > { %511 = vmatpush.msra.mxu0 %v488_v62  ;;  %659 = vmatpush.msra.mxu1 %v488_v62  ;;  %s650_s7 = sshll.u32 %s475_s14, 3  ;;  %s1229_s29 = sand.u32 1, %s839_s22  }
 0x178   : > { %s478_s24 = scalar_lea.vmem %s1021_s5, %s650_s7  ;;  %s537_s28 = sadd.s32 %s855_s26, %s668_s10 }
 0x179   : > { %512 = vmatpush.msra.mxu0 %v487_v63  ;;  %660 = vmatpush.msra.mxu1 %v487_v63  ;;  %v479_v6 = vld [vmem:[%s478_s24] sm:$0xff]  ;;  %s654_s13 = sshll.u32 %s537_s28, 3  ;;  %s527_s5 = scalar_lea.sflag [#allocation5], %s1229_s29 }
 0x17a   : > { %v482_v5 = vld [vmem:[#allocation2 + $0x8] sm:$0xff]  ;;  %480 = vst [vmem:[%s1025_s9] sm:$0xff] %v479_v6  ;;  %s539_s12 = scalar_lea.hbm %s1214_s6, %s654_s13  ;;  %s781_s24 = scalar_lea.hbm %s1214_s6, 96 }
 0x17b   : > { %513 = vmatpush.msra.mxu0 %v486_v0  ;;  %661 = vmatpush.msra.mxu1 %v486_v0  ;;  %s542_s8 = sshll.u32 %s539_s12, 4  ;;  %s543_s8 = int_to_ptr.hbm [resolvable:$true] %s542_s8 }
 0x17c   : > { %s775_s14 = sshra.s32 %s543_s8, 4  ;;  %s776_s14 = int_to_ptr.hbm [resolvable:$true] %s775_s14 }
 0x17d   : > { %514 = vmatpush.msra.mxu0 %v485_v1  ;;  %662 = vmatpush.msra.mxu1 %v485_v1  ;;  %s777_s27 = scalar_lea.hbm %s776_s14, 24  ;;  %p782_p8 = scmp.lt.s32.totalorder %s776_s14, %s1214_s6 }
 0x17e   : > { %p778_p5 = scmp.ne.s32.totalorder %s776_s14, %s777_s27  ;;  %p783_p9 = scmp.lt.s32.totalorder %s781_s24, %s777_s27 }
 0x17f   : > { %515 = vmatpush.msra.mxu0 %v484_v2  ;;  %663 = vmatpush.msra.mxu1 %v484_v2 }
 0x180   : > { %p779_p6 = pnand %p778_p5, %p991_p10  ;;  %p784_p11 = por %p783_p9, %p782_p8 }
 0x181   : > { %516 = vmatpush.msra.mxu0 %v483_v3  ;;  %664 = vmatpush.msra.mxu1 %v483_v3 }
 0x182   : > { %652 = vmatmul.msk.f32.vlgmr.msra.gmra.mxu0 %vm490_vm3, %v481_v4  ;;  %653 = vmatmul.msk.f32.vlgmr.msra.gmra.mxu1 %vm490_vm3, %v482_v5  ;;  %p780_p7 = pneg %p779_p6 }
 0x184   : > { %p785_p13 = pnand %p784_p11, %p780_p7 }
 0x1ff   : > { %v518_v7 = vpop.f32.mrf.mxu0  ;;  %v521_v8 = vpop.f32.mrf.mxu1 }
 0x200   : > { %524 = vst [vmem:[%s1025_s9 + $0x8] sm:$0xff] %v518_v7 }
 0x201   : > { %525 = vst [vmem:[%s1025_s9 + $0x10] sm:$0xff] %v521_v8 }
 0x202   : > { %788 = shalt.err (!%p785_p13)
}
 0x203   : > { %s874_s9 = smov 128   ;;  %s875_s13 = smov 256  }
 0x204   : > { %s876_s16 = smov 8  }
 0x205   : > { %669 = dma.vmem_to_hbm [thread:$0]  (%p991_p10), %s541_s17, 384, %s543_s8, %s527_s5, %s874_s9, %s875_s13, %s876_s16  }
 0x206 PF: > { %p675_p0 = scmp.ge.s32.totalorder %s871_s30, 2  ;;  %s557_s11 = sand.u32 1, %s835_s21  }
 0x207   : > { %s558_s12 = scalar_lea.sflag [#allocation5], %s557_s11 }
 0x208   : > { %p672_p1 = pnand %p675_p0, %p998_p12 }
 0x20a   : > { %p673_p2 = pneg %p672_p1 }
 0x20c   : > { %830 = dma.done.wait (%p673_p2), %s558_s12, 384  }
 0x20d   : > { %832 = vsyncadd (%p673_p2), %s558_s12, 4294966912  ;;  %s19_s30 = sadd.s32 1, %s871_s30   ;;  %s1230_s26 = sld [smem:[#allocation7_spill]] }
 0x20e   : > { %p16_p3 = scmp.ge.s32.totalorder %s19_s30, 6   ;;  %s1231_s27 = sld [smem:[#allocation8_spill]] }
 0x20f   : > { %s1232_s28 = sld [smem:[#allocation9_spill]]  ;;  %s1234_s21 = smov %s839_s22 }
 0x210   : > { %s1233_s29 = sld [smem:[#allocation10_spill]]  ;;  %s1235_s22 = smov %s843_s23 }
 0x211   : > { %s1236_s23 = smov %s996_s19  ;;  %s1237_s24 = smov %s851_s25 }
 0x212   : > { %s1238_s25 = smov %s985_s15  ;;  %18 = sbr.rel (!%p16_p3) target bundleno = 8 (0x8), region = 130 }
 0x217   :  { %564 = vsyncpa [#allocation5], 1 }
 0x218   :  { %566 = vsyncpa [#allocation5 + $0x1], 1 }

</bundles_post_ra>
